<compile_context>
chip_gen: v5e
topology: v5e:2x2
jax: 0.10.0
libtpu: 0.0.40
codegen_flags: <defaults>
</compile_context>

<pallas_src>
import functools
import math

import jax
import jax.numpy as jnp
from jax import lax
from jax.experimental import pallas as pl
from jax.experimental.pallas import tpu as pltpu


def _rmsnorm_kernel(x_ref, scale_ref, o_ref, *, eps: float):
    # The reference explicitly upcasts to float32 before the mean-square.
    x = x_ref[...].astype(jnp.float32)                  # (ROW_TILE, D) f32
    mean_sq = jnp.mean(x * x, axis=-1, keepdims=True)   # lane reduction -> XLU
    inv = lax.rsqrt(mean_sq + eps)                      # EUP (free vs ld/st slots)
    # scale_ref is pre-cast to f32 in the wrapper and stays resident in VMEM
    # (constant index_map), so the parameter cast is a one-time cost.
    o_ref[...] = (scale_ref[...] * (x * inv)).astype(o_ref.dtype)


def _round_up(n: int, m: int) -> int:
    return ((n + m - 1) // m) * m


def _chip_config():
    """Generation-aware (tile_vmem_budget, scoped_vmem_limit, two_tensorcores)."""
    cap = None
    try:
        cap = getattr(pltpu.get_tpu_info(), "vmem_capacity_bytes", None)
    except Exception:
        cap = None
    if cap is None:
        cap = 64 << 20                      # conservative: assume v7x-sized VMEM
    if cap >= (96 << 20):                   # v5e / v6e: 128 MiB physical VMEM
        return 56 << 20, 100 << 20, False   # big tiles; single TensorCore
    return 20 << 20, 44 << 20, True         # v7x: 64 MiB physical, 2 TCs/chip


def _pick_row_tile(rows: int, dim: int, x_itemsize: int, out_itemsize: int,
                   tile_budget: int, two_cores: bool) -> int:
    # Sublane packing: bf16/fp16 pack 16 rows/vreg, int8/fp8 pack 32, f32 packs 8.
    pack = {1: 32, 2: 16}.get(x_itemsize, 8)
    # Per-row VMEM footprint: double-buffered input + output blocks plus a
    # conservative ~8 B/elem of f32 intermediates (the upcast block stays live
    # across the reduce/normalize and Mosaic may hold a second f32 temp before
    # the down-cast store), so the largest tiles never spill or overflow VMEM.
    bytes_per_row = dim * (2 * x_itemsize + 2 * out_itemsize + 8)
    max_tile = max(pack, (tile_budget // bytes_per_row) // pack * pack)
    rows_p = _round_up(rows, pack)
    tile = min(max_tile, rows_p)
    # A handful of grid steps keeps the DMA pipeline double-buffered (and, on
    # 2-TensorCore chips, lets the 'parallel' axis shard evenly across cores),
    # but never shrink tiles below ~512 rows: large lane-dense tiles are what
    # keeps this memory-bound kernel near the HBM roofline.
    floor = min(tile, max(pack, _round_up(512, pack)))
    if rows_p > 4 * floor:
        target_steps = 4
    elif two_cores and rows_p > floor:
        target_steps = 2
    else:
        target_steps = 1                    # single TC: biggest tile that fits
    if target_steps > 1:
        cand = _round_up(-(-rows_p // target_steps), pack)
        tile = min(tile, max(cand, floor))
    return tile


def rmsnorm(x: jax.Array, scale: jax.Array, eps: float = 1e-5) -> jax.Array:
    """RMSNorm over the last axis of x. x: (..., dim), scale: (dim,)."""
    orig_shape = x.shape
    dim = orig_shape[-1]
    rows = math.prod(orig_shape[:-1]) if len(orig_shape) > 1 else 1
    x2d = x.reshape(rows, dim)
    # Hoist the parameter cast out of the kernel; the (1, dim) block is resident
    # across all grid steps.
    scale2d = scale.reshape(1, dim).astype(jnp.float32)

    out_dtype = x.dtype
    tile_budget, vmem_limit, two_cores = _chip_config()
    row_tile = _pick_row_tile(rows, dim, x.dtype.itemsize,
                              jnp.dtype(out_dtype).itemsize,
                              tile_budget, two_cores)

    # Ragged rows: no jnp.pad / out[:rows] slice (each would materialize a full
    # extra HBM copy). The last grid block may hang off the end of the array:
    # out-of-bounds rows read undefined values that only feed their own
    # (masked-out) stores; the per-row lane reduction never mixes rows.
    grid = (pl.cdiv(rows, row_tile),)

    # TODO(synk): for dim < 128, fold multiple logical rows into the 128-lane
    # axis with a segmented reduction so stores stay unmasked; for dims so wide
    # that one row tile no longer fits VMEM, add a second 'arbitrary' grid axis
    # over dim with a sum-of-squares scratch accumulator + pl.when finalize.

    out = pl.pallas_call(
        functools.partial(_rmsnorm_kernel, eps=eps),
        out_shape=jax.ShapeDtypeStruct((rows, dim), out_dtype),
        grid_spec=pltpu.PrefetchScalarGridSpec(
            num_scalar_prefetch=0,
            grid=grid,
            in_specs=[
                pl.BlockSpec((row_tile, dim), lambda i: (i, 0)),
                pl.BlockSpec((1, dim), lambda i: (0, 0)),
            ],
            out_specs=pl.BlockSpec((row_tile, dim), lambda i: (i, 0)),
        ),
        compiler_params=pltpu.CompilerParams(
            dimension_semantics=("parallel",),
            vmem_limit_bytes=vmem_limit,
        ),
    )(x2d, scale2d)

    return out.reshape(orig_shape)


def _ref_rmsnorm(x, scale, eps):
    xf = x.astype(jnp.float32)
    ms = jnp.mean(jnp.square(xf), axis=-1, keepdims=True)
    return (scale.astype(jnp.float32) * (xf / jnp.sqrt(ms + eps))).astype(x.dtype)


if __name__ == "__main__":
    key = jax.random.PRNGKey(0)

    # Primary case: bf16, dims divisible by the pack/lane sizes.
    batch, seq, dim = 2, 8, 256
    x = jax.random.normal(key, (batch, seq, dim), dtype=jnp.bfloat16)
    scale = jnp.ones((dim,), dtype=jnp.float32)   # nn.Parameter(torch.ones(dim))
    out = jax.block_until_ready(rmsnorm(x, scale, eps=1e-5))
    ref = _ref_rmsnorm(x, scale, 1e-5)
    assert out.shape == x.shape and out.dtype == x.dtype
    assert jnp.allclose(out.astype(jnp.float32), ref.astype(jnp.float32),
                        atol=1e-2, rtol=1e-2)

    # Secondary case: f32 input with a ragged row count (rows=15) exercising the
    # masked partial last block (no pad / slice in the wrapper).
    k2 = jax.random.PRNGKey(0)
    x2 = jax.random.normal(k2, (3, 5, 128), dtype=jnp.float32)
    scale2 = jnp.ones((128,), dtype=jnp.float32)
    out2 = jax.block_until_ready(rmsnorm(x2, scale2, eps=1e-5))
    ref2 = _ref_rmsnorm(x2, scale2, 1e-5)
    assert out2.shape == x2.shape and out2.dtype == x2.dtype
    assert jnp.allclose(out2, ref2, atol=1e-5, rtol=1e-5)

    print("KERNEL_OK")
</pallas_src>

<mosaic_0001>
module attributes {stable_mosaic.version = 11 : i64} {
  func.func @_rmsnorm_kernel(%arg0: i32, %arg1: memref<16x256xbf16, #tpu.memory_space<vmem>>, %arg2: memref<1x256xf32, #tpu.memory_space<vmem>>, %arg3: memref<16x256xbf16, #tpu.memory_space<vmem>>) attributes {dimension_semantics = [#tpu.dimension_semantics<parallel>], iteration_bounds = array<i64: 1>, scalar_prefetch = 0 : i64, scratch_operands = 0 : i64, tpu.core_type = #tpu.core_type<tc>, window_params = [{transform_indices = @transform_0, window_bounds = array<i64: 16, 256>}, {pipeline_mode = #tpu.pipeline_mode<synchronous>, transform_indices = @transform_1, window_bounds = array<i64: 1, 256>}, {transform_indices = @transform_2, window_bounds = array<i64: 16, 256>}]} {
    %c0 = arith.constant 0 : index
    %c0_0 = arith.constant 0 : index
    %0 = vector.load %arg1[%c0, %c0_0] : memref<16x256xbf16, #tpu.memory_space<vmem>>, vector<16x256xbf16>
    %1 = arith.extf %0 : vector<16x256xbf16> to vector<16x256xf32>
    %2 = arith.mulf %1, %1 : vector<16x256xf32>
    %cst = arith.constant dense<0.000000e+00> : vector<16xf32>
    %3 = vector.multi_reduction <add>, %2, %cst [1] : vector<16x256xf32> to vector<16xf32>
    %4 = vector.shape_cast %3 : vector<16xf32> to vector<16x1xf32>
    %cst_1 = arith.constant 2.560000e+02 : f32
    %5 = vector.broadcast %cst_1 : f32 to vector<16x1xf32>
    %6 = arith.divf %4, %5 : vector<16x1xf32>
    %cst_2 = arith.constant 9.99999974E-6 : f32
    %7 = vector.broadcast %cst_2 : f32 to vector<16x1xf32>
    %8 = arith.addf %6, %7 : vector<16x1xf32>
    %9 = math.rsqrt %8 : vector<16x1xf32>
    %c0_3 = arith.constant 0 : index
    %c0_4 = arith.constant 0 : index
    %10 = vector.load %arg2[%c0_3, %c0_4] : memref<1x256xf32, #tpu.memory_space<vmem>>, vector<1x256xf32>
    %11 = vector.broadcast %9 : vector<16x1xf32> to vector<16x256xf32>
    %12 = arith.mulf %1, %11 : vector<16x256xf32>
    %13 = vector.broadcast %10 : vector<1x256xf32> to vector<16x256xf32>
    %14 = arith.mulf %13, %12 : vector<16x256xf32>
    %15 = arith.truncf %14 : vector<16x256xf32> to vector<16x256xbf16>
    %c0_5 = arith.constant 0 : index
    %c0_6 = arith.constant 0 : index
    %16 = vector.load %arg3[%c0_5, %c0_6] : memref<16x256xbf16, #tpu.memory_space<vmem>>, vector<16x256xbf16>
    tpu.vector_store %arg3[%c0_5, %c0_6], %15 {strides = array<i32>} : memref<16x256xbf16, #tpu.memory_space<vmem>>, vector<16x256xbf16>,
    return
  }
  func.func @transform_0(%arg0: i32) -> (i32, i32) {
    %c0_i32 = arith.constant 0 : i32
    %c0_i32_0 = arith.constant 0 : i32
    return %arg0, %c0_i32 : i32, i32
  }
  func.func @transform_1(%arg0: i32) -> (i32, i32) {
    %c0_i32 = arith.constant 0 : i32
    %c0_i32_0 = arith.constant 0 : i32
    %c0_i32_1 = arith.constant 0 : i32
    return %c0_i32, %c0_i32_0 : i32, i32
  }
  func.func @transform_2(%arg0: i32) -> (i32, i32) {
    %c0_i32 = arith.constant 0 : i32
    %c0_i32_0 = arith.constant 0 : i32
    return %arg0, %c0_i32 : i32, i32
  }
}

</mosaic_0001>

<bundles_post_ra>
// kernel: tpu_custom_call.1
= control target key start
LH: loop header
LB: loop body
LE: loop exit
PB: predicated region body
PF: predicated region fallthrough
CT: control target
= control target key end

     0   :  { %7 = vsyncpa [#allocation3], 0  ;;  %s253_s0 = inlined_call_operand.hbm [shape: bf16[16,256], index: 0, kind: input, shape index: {}]   ;;  %s254_s1 = inlined_call_operand.hbm [shape: f32[1,256], index: 1, kind: input, shape index: {}]   ;;  %s255_s2 = inlined_call_operand.hbm [shape: bf16[16,256], index: 2, kind: output, shape index: {}]  }
   0x1   :  { %8 = vsyncpa [#allocation6], 0 }
   0x2   :  { %9 = vsyncpa [#allocation4], 0  ;;  %s14_s11 = sshll.u32 %s253_s0, 4  ;;  %s217_s12 = smov [#allocation2]   ;;  %s15_s11 = int_to_ptr.hbm [resolvable:$true] %s14_s11 }
   0x3   :  { %s16_s13 = sshll.u32 %s217_s12, 4  ;;  %s28_s16 = sshll.u32 %s254_s1, 4  ;;  %s17_s13 = int_to_ptr.vmem [resolvable:$true] %s16_s13  ;;  %s29_s16 = int_to_ptr.hbm [resolvable:$true] %s28_s16 }
   0x4   :  { %s218_s17 = smov 128   ;;  %s219_s18 = smov 8  }
   0x5   :  { %22 = dma.hbm_to_vmem [thread:$0]  %s15_s11, 256, %s17_s13, [#allocation3], %s218_s17, %s218_s17, %s219_s18  }
   0x6   :  { %s220_s19 = smov [#allocation5]  }
   0x7   :  { %s30_s20 = sshll.u32 %s220_s19, 4  ;;  %s31_s20 = int_to_ptr.vmem [resolvable:$true] %s30_s20 }
   0x8   :  { %33 = dma.hbm_to_vmem [thread:$0]  %s29_s16, 32, %s31_s20, [#allocation6]  }
   0x9   :  { %211 = dma.done.wait [#allocation3], 256  }
   0xa   :  { %212 = vsyncadd [#allocation3], 4294967040 }
   0xb   :  { %213 = dma.done.wait [#allocation6], 32  }
   0xc   :  { %214 = vsyncadd [#allocation6], 4294967264  ;;  %v42_v0 = vld [vmem:[#allocation2] sm:$0xff]  ;;  %v43_v1 = vld [vmem:[#allocation2 + $0x8] sm:$0xff]  ;;  %v221_v12 = vmov 256.0   ;;  %s222_s0 = smov [#allocation7]  }
   0xd   :  { %v44_v2 = vunpack.c.l.bf16 %v42_v0  ;;  %v45_v3 = vunpack.c.h.bf16 %v42_v0  ;;  %v46_v6 = vunpack.c.l.bf16 %v43_v1  ;;  %v47_v7 = vunpack.c.h.bf16 %v43_v1  ;;  %v89_v30 = vld [vmem:[#allocation5] sm:$0x3]  ;;  %s111_s1 = sshll.u32 %s222_s0, 4  ;;  %s113_s23 = sshll.u32 %s255_s2, 4  ;;  %s112_s1 = int_to_ptr.vmem [resolvable:$true] %s111_s1  ;;  %s114_s23 = int_to_ptr.hbm [resolvable:$true] %s113_s23 }
   0xe   :  { %133 = vrcp.f32 %v221_v12  ;;  %v95_v34 = vperm.slane %v89_v30, 0  ;;  %v96_v35 = vperm.slane %v89_v30, 1 }
   0xf   :  { %v48_v4 = vmul.f32 %v44_v2, %v44_v2  ;;  %v49_v5 = vmul.f32 %v45_v3, %v45_v3  ;;  %v50_v9 = vmul.f32 %v46_v6, %v46_v6  ;;  %v51_v10 = vmul.f32 %v47_v7, %v47_v7 }
  0x11   :  { %v52_v8 = vadd.f32 %v49_v5, %v48_v4  ;;  %v55_v11 = vadd.f32 %v51_v10, %v50_v9 }
  0x13   :  { %53 = vadd.xlane.f32.xlu0 %v52_v8 }
  0x14   :  { %v134_v13 = vpop.eup %133 }
  0x15   :  { %v59_v14 = vmul.f32 256.0, %v134_v13  ;;  %vm63_vm0 = vweird.f32 %v134_v13 }
  0x17   :  { %v60_v15 = vsub.f32 1.0, %v59_v14 }
  0x19   :  { %v61_v16 = vmul.f32 %v134_v13, %v60_v15 }
  0x1b   :  { %56 = vadd.xlane.f32.xlu0 %v55_v11  ;;  %v62_v17 = vadd.f32 %v134_v13, %v61_v16 }
  0x1d   :  { %v64_v18 = vsel %vm63_vm0, %v134_v13, %v62_v17 }
  0x86   :  { %v54_v19 = vpop.xlane.xlu0 %53 }
  0x87   :  { %v65_v20 = vmul.f32 %v64_v18, %v54_v19 }
  0x89   :  { %v67_v21 = vadd.f32 1e-05, %v65_v20 }
  0x8b   :  { %135 = vrsqrt.f32 %v67_v21  ;;  %vm75_vm2 = vweird.f32 %v67_v21 }
  0x8e   :  { %v57_v22 = vpop.xlane.xlu0 %56 }
  0x8f   :  { %v66_v23 = vmul.f32 %v64_v18, %v57_v22 }
  0x91   :  { %v136_v24 = vpop.eup %135  ;;  %v68_v25 = vadd.f32 1e-05, %v66_v23 }
  0x92   :  { %v70_v26 = vmul.f32 %v136_v24, %v67_v21  ;;  %vm76_vm1 = vweird.f32 %v136_v24 }
  0x93   :  { %137 = vrsqrt.f32 %v68_v25  ;;  %vm77_vm3 = vmor %vm75_vm2, %vm76_vm1  ;;  %vm85_vm5 = vweird.f32 %v68_v25 }
  0x94   :  { %v71_v27 = vmul.f32 %v136_v24, %v70_v26 }
  0x96   :  { %v72_v28 = vmul.f32 0.5, %v71_v27 }
  0x98   :  { %v73_v29 = vsub.f32 1.5, %v72_v28 }
  0x99   :  { %v138_v31 = vpop.eup %137 }
  0x9a   :  { %v74_v32 = vmul.f32 %v136_v24, %v73_v29  ;;  %v80_v33 = vmul.f32 %v138_v31, %v68_v25  ;;  %vm86_vm4 = vweird.f32 %v138_v31 }
  0x9b   :  { %vm87_vm6 = vmor %vm85_vm5, %vm86_vm4 }
  0x9c   :  { %v78_v36 = vsel %vm77_vm3, %v136_v24, %v74_v32  ;;  %v81_v37 = vmul.f32 %v138_v31, %v80_v33 }
  0x9d   :  { %v90_v38 = vmul.f32 %v78_v36, %v44_v2  ;;  %v91_v39 = vmul.f32 %v78_v36, %v45_v3 }
  0x9e   :  { %v82_v40 = vmul.f32 0.5, %v81_v37 }
  0x9f   :  { %v99_v41 = vmul.f32 %v95_v34, %v90_v38  ;;  %v100_v42 = vmul.f32 %v96_v35, %v91_v39 }
  0xa0   :  { %v83_v43 = vsub.f32 1.5, %v82_v40 }
  0xa1   :  { %v103_v44 = vpack.c.bf16 %v100_v42, %v99_v41 }
  0xa2   :  { %v84_v45 = vmul.f32 %v138_v31, %v83_v43 }
  0xa3   :  { %105 = vst [vmem:[#allocation7] sm:$0xff] %v103_v44 }
  0xa4   :  { %v88_v46 = vsel %vm87_vm6, %v138_v31, %v84_v45 }
  0xa5   :  { %v92_v47 = vmul.f32 %v88_v46, %v46_v6  ;;  %v93_v48 = vmul.f32 %v88_v46, %v47_v7 }
  0xa7   :  { %v101_v49 = vmul.f32 %v95_v34, %v92_v47  ;;  %v102_v50 = vmul.f32 %v96_v35, %v93_v48 }
  0xa9   :  { %v104_v51 = vpack.c.bf16 %v102_v50, %v101_v49 }
  0xab   :  { %106 = vst [vmem:[#allocation7 + $0x8] sm:$0xff] %v104_v51 }
  0xac   :  { %119 = dma.vmem_to_hbm [thread:$0]  %s112_s1, 256, %s114_s23, [#allocation4], %s218_s17, %s218_s17, %s219_s18  }
  0xad   :  { %215 = dma.done.wait [#allocation4], 256  }
  0xae   :  { %216 = vsyncadd [#allocation4], 4294967040 }
  0xaf   :  { %124 = vsyncpa [#allocation3], 1 }
  0xb0   :  { %125 = vsyncpa [#allocation6], 1 }
  0xb1   :  { %126 = vsyncpa [#allocation4], 1 }

</bundles_post_ra>
